<compile_context>
chip_gen: v7x
topology: tpu7x:2x2x1
jax: 0.10.0
libtpu: 0.0.40
codegen_flags: <defaults>
</compile_context>

<pallas_src>
import functools

import jax
import jax.numpy as jnp
from jax.experimental import pallas as pl
from jax.experimental.pallas import tpu as pltpu

H1, H2 = 256, 128          # hidden dims fixed by the module definition


def _round_up(x, m):
    return ((x + m - 1) // m) * m


def mlp_kernel(x_ref, w1_ref, b1_ref, w2_ref, b2_ref, w3_ref, b3_ref, o_ref):
    """Fused 3-layer MLP for one batch tile (all operands resident in VMEM).

    x_ref : (TB, F)   f32/bf16   w1_ref: (F, 256)  bf16   b1_ref: (1, 256)  f32
    w2_ref: (256,128) bf16       b2_ref: (1, 128)  f32
    w3_ref: (128, Cp) bf16       b3_ref: (1, Cp)   f32    o_ref : (TB, Cp)  bf16
    """
    # Cast the activations to bf16 on the VPU (kernel is MXU/DMA bound).
    x = x_ref[...].astype(jnp.bfloat16)

    # Layer 1: bf16 matmul on the MXU with f32 accumulation; bias/ReLU in f32.
    h1 = jnp.dot(x, w1_ref[...], preferred_element_type=jnp.float32)
    h1 = jnp.maximum(h1 + b1_ref[...], 0.0).astype(jnp.bfloat16)

    # Layer 2: Linear + ReLU
    h2 = jnp.dot(h1, w2_ref[...], preferred_element_type=jnp.float32)
    h2 = jnp.maximum(h2 + b2_ref[...], 0.0).astype(jnp.bfloat16)

    # Layer 3: Linear (logits, no activation) -- lane-dense bf16 store.
    out = jnp.dot(h2, w3_ref[...], preferred_element_type=jnp.float32) + b3_ref[...]
    o_ref[...] = out.astype(o_ref.dtype)


def prepare_params(params):
    """One-time device-side prep: cast weights to bf16 (native MXU dtype),
    keep biases f32, and zero-pad the class dim to a multiple of 128 lanes so
    the kernel's final matmul / store are lane-dense."""
    w1, b1, w2, b2, w3, b3 = params
    C = w3.shape[1]
    C_pad = _round_up(C, 128)
    w1p = jnp.asarray(w1, jnp.bfloat16)
    w2p = jnp.asarray(w2, jnp.bfloat16)
    w3p = jnp.pad(w3, ((0, 0), (0, C_pad - C))).astype(jnp.bfloat16)
    b1p = jnp.asarray(b1, jnp.float32)
    b2p = jnp.asarray(b2, jnp.float32)
    b3p = jnp.pad(b3, ((0, 0), (0, C_pad - C))).astype(jnp.float32)
    return (w1p, b1p, w2p, b2p, w3p, b3p)


def _vmem_bytes(tb, F, C_pad, x_itemsize):
    return (2 * tb * F * x_itemsize                     # double-buffered x tiles
            + 2 * tb * C_pad * 2                        # double-buffered out tiles (bf16)
            + (F * H1 + H1 * H2 + H2 * C_pad) * 2       # single-buffered bf16 weights
            + (H1 + H2 + C_pad) * 4)                    # f32 biases


@functools.partial(jax.jit, static_argnames=("num_cls", "tile_b"))
def classifier_mlp(x, prepared_params, *, num_cls, tile_b=2048):
    """Fused MLP head. `prepared_params` must come from prepare_params().
    Semantically identical to the PyTorch module's forward (y = x @ W.T + b
    per layer, ReLU in between); returns f32 logits of shape (B, num_cls)."""
    w1p, b1p, w2p, b2p, w3p, b3p = prepared_params
    B, F = x.shape
    C_pad = w3p.shape[1]
    C = num_cls

    # ---- batch tile selection -------------------------------------------------
    B8 = _round_up(B, 8)
    tb = _round_up(min(tile_b, B8), 8)

    # Shrink the tile until the (double-buffered tiles + resident weights)
    # footprint fits a conservative budget (well under v7x's 64 MiB VMEM).
    budget = 28 << 20
    while tb > 8 and _vmem_bytes(tb, F, C_pad, x.dtype.itemsize) > budget:
        tb = max(8, _round_up(tb // 2, 8))

    # Rebalance the tile so batch padding is minimal for the implied step count.
    steps = pl.cdiv(B8, tb)
    tb = _round_up(pl.cdiv(B8, steps), 8)

    # v7x has 2 TensorCores; shard the batch axis across them only when each
    # core still gets >= ~1024 rows (keeps step-overhead amortization intact).
    if pl.cdiv(B8, tb) == 1 and B8 >= 2048:
        tb = _round_up(pl.cdiv(B8, 2), 8)

    grid0 = pl.cdiv(B8, tb)
    B_pad = grid0 * tb

    # Pad the batch dim only when the tile does not divide it (no feature-dim
    # padding and no wrapper-side dtype cast of x).
    xp = x if B_pad == B else jnp.pad(x, ((0, B_pad - B), (0, 0)))

    resident = functools.partial(pl.BlockSpec, index_map=lambda i: (0, 0),
                                 pipeline_mode=pl.Buffered(1))
    in_specs = [
        pl.BlockSpec((tb, F), lambda i: (i, 0)),   # x: tiled over batch
        resident(w1p.shape),                       # weights/biases: constant block,
        resident(b1p.shape),                       # single-buffered residency
        resident(w2p.shape),
        resident(b2p.shape),
        resident(w3p.shape),
        resident(b3p.shape),
    ]
    out_spec = pl.BlockSpec((tb, C_pad), lambda i: (i, 0))

    vmem_bytes = _vmem_bytes(tb, F, C_pad, x.dtype.itemsize)
    vmem_limit = int(min(max(vmem_bytes + (4 << 20), 8 << 20), 32 << 20))

    flops = 2 * B_pad * (F * H1 + H1 * H2 + H2 * C_pad)
    bytes_accessed = (xp.size * xp.dtype.itemsize
                      + (w1p.size + w2p.size + w3p.size) * 2
                      + (b1p.size + b2p.size + b3p.size) * 4
                      + B_pad * C_pad * 2)

    out = pl.pallas_call(
        mlp_kernel,
        out_shape=jax.ShapeDtypeStruct((B_pad, C_pad), jnp.bfloat16),
        grid_spec=pltpu.PrefetchScalarGridSpec(
            num_scalar_prefetch=0,
            grid=(grid0,),
            in_specs=in_specs,
            out_specs=out_spec,
        ),
        compiler_params=pltpu.CompilerParams(
            dimension_semantics=("parallel",),
            vmem_limit_bytes=vmem_limit,
        ),
        cost_estimate=pl.CostEstimate(
            flops=flops, transcendentals=0, bytes_accessed=bytes_accessed),
    )(xp, w1p, b1p, w2p, b2p, w3p, b3p)

    # Slice away batch/class padding; return f32 logits like the torch module.
    return out[:B, :C].astype(jnp.float32)


def init_params(key, in_feature, num_cls):
    """Deterministic init mimicking PyTorch's default Linear init:
    U(-1/sqrt(fan_in), 1/sqrt(fan_in)) for weight and bias. Weights stored as
    (fan_in, fan_out) so y = x @ W + b == torch's x @ W.T + b."""
    dims = [(in_feature, H1), (H1, H2), (H2, num_cls)]
    params = []
    for fan_in, fan_out in dims:
        key, kw, kb = jax.random.split(key, 3)
        bound = 1.0 / jnp.sqrt(float(fan_in))
        w = jax.random.uniform(kw, (fan_in, fan_out), jnp.float32, -bound, bound)
        b = jax.random.uniform(kb, (1, fan_out), jnp.float32, -bound, bound)
        params += [w, b]
    return tuple(params)


def reference_mlp(x, params):
    w1, b1, w2, b2, w3, b3 = params
    h1 = jnp.maximum(x @ w1 + b1, 0.0)
    h2 = jnp.maximum(h1 @ w2 + b2, 0.0)
    return h2 @ w3 + b3


if __name__ == "__main__":
    key = jax.random.PRNGKey(0)
    batch, in_feature, num_cls = 64, 32, 10

    k_x, k_p = jax.random.split(key)
    x = jax.random.normal(k_x, (batch, in_feature), jnp.float32)
    params = init_params(k_p, in_feature, num_cls)
    prepared = prepare_params(params)   # one-time pad/cast of weights & biases

    out = classifier_mlp(x, prepared, num_cls=num_cls)
    out = jax.block_until_ready(out)

    ref = reference_mlp(x, params)
    assert out.shape == (batch, num_cls)
    # bf16 operands / bf16 logit store (f32 accumulation) => ~1e-2 rel error.
    assert jnp.allclose(out, ref, atol=5e-2, rtol=5e-2), "mismatch vs reference"

    print("KERNEL_OK")
</pallas_src>

<mosaic_0001>
module attributes {stable_mosaic.version = 11 : i64} {
  func.func @mlp_kernel(%arg0: i32, %arg1: memref<64x32xf32, #tpu.memory_space<vmem>>, %arg2: memref<32x256xbf16, #tpu.memory_space<vmem>>, %arg3: memref<1x256xf32, #tpu.memory_space<vmem>>, %arg4: memref<256x128xbf16, #tpu.memory_space<vmem>>, %arg5: memref<1x128xf32, #tpu.memory_space<vmem>>, %arg6: memref<128x128xbf16, #tpu.memory_space<vmem>>, %arg7: memref<1x128xf32, #tpu.memory_space<vmem>>, %arg8: memref<64x128xbf16, #tpu.memory_space<vmem>>) attributes {dimension_semantics = [#tpu.dimension_semantics<parallel>], iteration_bounds = array<i64: 1>, scalar_prefetch = 0 : i64, scratch_operands = 0 : i64, tpu.core_type = #tpu.core_type<tc>, window_params = [{transform_indices = @transform_0, window_bounds = array<i64: 64, 32>}, {pipeline_mode = #tpu.pipeline_mode<synchronous>, transform_indices = @transform_1, window_bounds = array<i64: 32, 256>}, {pipeline_mode = #tpu.pipeline_mode<synchronous>, transform_indices = @transform_2, window_bounds = array<i64: 1, 256>}, {pipeline_mode = #tpu.pipeline_mode<synchronous>, transform_indices = @transform_3, window_bounds = array<i64: 256, 128>}, {pipeline_mode = #tpu.pipeline_mode<synchronous>, transform_indices = @transform_4, window_bounds = array<i64: 1, 128>}, {pipeline_mode = #tpu.pipeline_mode<synchronous>, transform_indices = @transform_5, window_bounds = array<i64: 128, 128>}, {pipeline_mode = #tpu.pipeline_mode<synchronous>, transform_indices = @transform_6, window_bounds = array<i64: 1, 128>}, {transform_indices = @transform_7, window_bounds = array<i64: 64, 128>}]} {
    %c0 = arith.constant 0 : index
    %c0_0 = arith.constant 0 : index
    %0 = vector.load %arg1[%c0, %c0_0] : memref<64x32xf32, #tpu.memory_space<vmem>>, vector<64x32xf32>
    %1 = arith.truncf %0 : vector<64x32xf32> to vector<64x32xbf16>
    %c0_1 = arith.constant 0 : index
    %c0_2 = arith.constant 0 : index
    %2 = vector.load %arg2[%c0_1, %c0_2] : memref<32x256xbf16, #tpu.memory_space<vmem>>, vector<32x256xbf16>
    %cst = arith.constant dense<0.000000e+00> : vector<64x256xf32>
    %3 = tpu.matmul %1, %2, %cst {dimension_numbers = #tpu.dot_dimension_numbers<[1], [0], [0], [1], [0, 0, 1, 1], [], []>} : vector<64x32xbf16>, vector<32x256xbf16>, vector<64x256xf32> -> vector<64x256xf32>
    %c0_3 = arith.constant 0 : index
    %c0_4 = arith.constant 0 : index
    %4 = vector.load %arg3[%c0_3, %c0_4] : memref<1x256xf32, #tpu.memory_space<vmem>>, vector<1x256xf32>
    %5 = vector.broadcast %4 : vector<1x256xf32> to vector<64x256xf32>
    %6 = arith.addf %3, %5 : vector<64x256xf32>
    %cst_5 = arith.constant 0.000000e+00 : f32
    %7 = vector.broadcast %cst_5 : f32 to vector<64x256xf32>
    %8 = arith.maximumf %6, %7 : vector<64x256xf32>
    %9 = arith.truncf %8 : vector<64x256xf32> to vector<64x256xbf16>
    %c0_6 = arith.constant 0 : index
    %c0_7 = arith.constant 0 : index
    %10 = vector.load %arg4[%c0_6, %c0_7] : memref<256x128xbf16, #tpu.memory_space<vmem>>, vector<256x128xbf16>
    %cst_8 = arith.constant dense<0.000000e+00> : vector<64x128xf32>
    %11 = tpu.matmul %9, %10, %cst_8 {dimension_numbers = #tpu.dot_dimension_numbers<[1], [0], [0], [1], [0, 0, 1, 1], [], []>} : vector<64x256xbf16>, vector<256x128xbf16>, vector<64x128xf32> -> vector<64x128xf32>
    %c0_9 = arith.constant 0 : index
    %c0_10 = arith.constant 0 : index
    %12 = vector.load %arg5[%c0_9, %c0_10] : memref<1x128xf32, #tpu.memory_space<vmem>>, vector<1x128xf32>
    %13 = vector.broadcast %12 : vector<1x128xf32> to vector<64x128xf32>
    %14 = arith.addf %11, %13 : vector<64x128xf32>
    %cst_11 = arith.constant 0.000000e+00 : f32
    %15 = vector.broadcast %cst_11 : f32 to vector<64x128xf32>
    %16 = arith.maximumf %14, %15 : vector<64x128xf32>
    %17 = arith.truncf %16 : vector<64x128xf32> to vector<64x128xbf16>
    %c0_12 = arith.constant 0 : index
    %c0_13 = arith.constant 0 : index
    %18 = vector.load %arg6[%c0_12, %c0_13] : memref<128x128xbf16, #tpu.memory_space<vmem>>, vector<128x128xbf16>
    %cst_14 = arith.constant dense<0.000000e+00> : vector<64x128xf32>
    %19 = tpu.matmul %17, %18, %cst_14 {dimension_numbers = #tpu.dot_dimension_numbers<[1], [0], [0], [1], [0, 0, 1, 1], [], []>} : vector<64x128xbf16>, vector<128x128xbf16>, vector<64x128xf32> -> vector<64x128xf32>
    %c0_15 = arith.constant 0 : index
    %c0_16 = arith.constant 0 : index
    %20 = vector.load %arg7[%c0_15, %c0_16] : memref<1x128xf32, #tpu.memory_space<vmem>>, vector<1x128xf32>
    %21 = vector.broadcast %20 : vector<1x128xf32> to vector<64x128xf32>
    %22 = arith.addf %19, %21 : vector<64x128xf32>
    %23 = arith.truncf %22 : vector<64x128xf32> to vector<64x128xbf16>
    %c0_17 = arith.constant 0 : index
    %c0_18 = arith.constant 0 : index
    %24 = vector.load %arg8[%c0_17, %c0_18] : memref<64x128xbf16, #tpu.memory_space<vmem>>, vector<64x128xbf16>
    tpu.vector_store %arg8[%c0_17, %c0_18], %23 {strides = array<i32>} : memref<64x128xbf16, #tpu.memory_space<vmem>>, vector<64x128xbf16>,
    return
  }
  func.func @transform_0(%arg0: i32) -> (i32, i32) {
    %c0_i32 = arith.constant 0 : i32
    %c0_i32_0 = arith.constant 0 : i32
    return %arg0, %c0_i32 : i32, i32
  }
  func.func @transform_1(%arg0: i32) -> (i32, i32) {
    %c0_i32 = arith.constant 0 : i32
    %c0_i32_0 = arith.constant 0 : i32
    %c0_i32_1 = arith.constant 0 : i32
    return %c0_i32, %c0_i32_0 : i32, i32
  }
  func.func @transform_2(%arg0: i32) -> (i32, i32) {
    %c0_i32 = arith.constant 0 : i32
    %c0_i32_0 = arith.constant 0 : i32
    %c0_i32_1 = arith.constant 0 : i32
    return %c0_i32, %c0_i32_0 : i32, i32
  }
  func.func @transform_3(%arg0: i32) -> (i32, i32) {
    %c0_i32 = arith.constant 0 : i32
    %c0_i32_0 = arith.constant 0 : i32
    %c0_i32_1 = arith.constant 0 : i32
    return %c0_i32, %c0_i32_0 : i32, i32
  }
  func.func @transform_4(%arg0: i32) -> (i32, i32) {
    %c0_i32 = arith.constant 0 : i32
    %c0_i32_0 = arith.constant 0 : i32
    %c0_i32_1 = arith.constant 0 : i32
    return %c0_i32, %c0_i32_0 : i32, i32
  }
  func.func @transform_5(%arg0: i32) -> (i32, i32) {
    %c0_i32 = arith.constant 0 : i32
    %c0_i32_0 = arith.constant 0 : i32
    %c0_i32_1 = arith.constant 0 : i32
    return %c0_i32, %c0_i32_0 : i32, i32
  }
  func.func @transform_6(%arg0: i32) -> (i32, i32) {
    %c0_i32 = arith.constant 0 : i32
    %c0_i32_0 = arith.constant 0 : i32
    %c0_i32_1 = arith.constant 0 : i32
    return %c0_i32, %c0_i32_0 : i32, i32
  }
  func.func @transform_7(%arg0: i32) -> (i32, i32) {
    %c0_i32 = arith.constant 0 : i32
    %c0_i32_0 = arith.constant 0 : i32
    return %arg0, %c0_i32 : i32, i32
  }
}

</mosaic_0001>

<bundles_post_ra>
// kernel: classifier_mlp.1
= control target key start
LH: loop header
LB: loop body
LE: loop exit
PB: predicated region body
PF: predicated region fallthrough
CT: control target
= control target key end

     0   :  { %12 = vsyncpa [#allocation3], 0  ;;  %s799_s24 = smov [#allocation2]   ;;  %s940_s0 = inlined_call_operand.vmem [shape: f32[64,32], index: 0, kind: input, shape index: {}]   ;;  %s941_s1 = inlined_call_operand.vmem [shape: bf16[32,256], index: 1, kind: input, shape index: {}]   ;;  %s942_s2 = inlined_call_operand.vmem [shape: f32[1,256], index: 2, kind: input, shape index: {}]   ;;  %s943_s3 = inlined_call_operand.hbm [shape: bf16[256,128], index: 3, kind: input, shape index: {}]   ;;  %s944_s4 = inlined_call_operand.vmem [shape: f32[1,128], index: 4, kind: input, shape index: {}]   ;;  %s945_s5 = inlined_call_operand.vmem [shape: bf16[128,128], index: 5, kind: input, shape index: {}]   ;;  %s946_s6 = inlined_call_operand.vmem [shape: f32[1,128], index: 6, kind: input, shape index: {}]   ;;  %s947_s7 = inlined_call_operand.vmem [shape: bf16[64,128], index: 7, kind: output, shape index: {}]  }
   0x1   :  { %s24_s25 = sshll.u32 %s799_s24, 4  ;;  %s775_s28 = scalar_lea.hbm %s943_s3, 2048  ;;  %s25_s25 = int_to_ptr.vmem [resolvable:$true] %s24_s25 }
   0x2   :  { %p776_p0 = scmp.ne.s32.totalorder %s943_s3, %s775_s28  ;;  %p779_p1 = scmp.lt.u32.totalorder %s775_s28, %s943_s3 }
   0x4   :  { %p781_p2 = pnand %p779_p1, %p776_p0 }
   0x6   :  { %784 = shalt.err (!%p781_p2)
}
   0x7   :  { %s785_s10 = scalar_lea.vmem %s25_s25, 2048  ;;  %p790_p4 = scmp.lt.s32.totalorder %s25_s25, %s25_s25 }
   0x8   :  { %p786_p3 = scmp.ne.s32.totalorder %s25_s25, %s785_s10  ;;  %p791_p5 = scmp.lt.s32.totalorder %s785_s10, %s785_s10 }
   0xa   :  { %p792_p6 = por %p791_p5, %p790_p4 }
   0xc   :  { %p793_p7 = pnand %p792_p6, %p786_p3 }
   0xe   :  { %796 = shalt.err (!%p793_p7)
}
   0xf   :  { %s800_s11 = smov 64   ;;  %s801_s12 = smov 4  }
  0x10   :  { %30 = dma.hbm_to_vmem [thread:$0]  %s943_s3, 2048, %s25_s25, [#allocation3], %s800_s11, %s800_s11, %s801_s12  }
  0x11   :  { %797 = dma.done.wait [#allocation3], 2048  }
  0x12   :  { %798 = vsyncadd [#allocation3], 4294965248  ;;  %v802_v0 = vmov 0   ;;  %v745_v1 = vld [vmem:[%s941_s1 + $0x4] ss:$8 sps:$4 sm:$0xff]   ;;  %vm89_vm0 = vcmask 261120   ;;  %v59_v36 = vlaneseq }
  0x13   :  { %134 = vmatprep.mubr.bf16.mxu0 %v802_v0  ;;  %v747_v2 = vld [vmem:[%s941_s1] ss:$8 sps:$4 sm:$0xff]   ;;  %102 = vmatprep.subr.bf16.mxu0 %v745_v1  ;;  %v748_v3 = vld [vmem:[%s941_s1 + $0x14] ss:$8 sps:$4 sm:$0xff]   ;;  %v750_v4 = vld [vmem:[%s941_s1 + $0x10] ss:$8 sps:$4 sm:$0xff]  }
  0x14   :  { %103 = vmatpush1.bf16.msra.mxu0 %v747_v2  ;;  %v41_v5 = vld [vmem:[%s940_s0] sm:$0xff]  ;;  %v42_v6 = vld [vmem:[%s940_s0 + $0x8] sm:$0xff]  ;;  %v43_v11 = vld [vmem:[%s940_s0 + $0x10] sm:$0xff]  ;;  %v60_v37 = vshrl.u32 %v59_v36, 7 }
  0x15   :  { %104 = vmatprep.subr.bf16.mxu0 %v748_v3  ;;  %v49_v7 = vpack.c.bf16 %v42_v6, %v41_v5  ;;  %v751_v8 = vld [vmem:[#allocation2 + $0x40] sm:$0xff]   ;;  %v753_v10 = vld [vmem:[#allocation2 + $0x48] sm:$0xff]   ;;  %v755_v13 = vld [vmem:[#allocation2 + $0x50] sm:$0xff]  }
  0x16   :  { %v752_v9 = vld [vmem:[#allocation2] sm:$0xff]   ;;  %665 = vmatprep.subr.bf16.mxu1 %v751_v8  ;;  %v754_v12 = vld [vmem:[#allocation2 + $0x8] sm:$0xff]   ;;  %v44_v14 = vld [vmem:[%s940_s0 + $0x18] sm:$0xff]  ;;  %v61_v38 = vsub.s32 0, %v60_v37  ;;  %v65_v40 = vsub.s32 1, %v60_v37 }
  0x17   :  { %666 = vmatpush3.bf16.msra.mxu1 %v752_v9  ;;  %v756_v15 = vld [vmem:[#allocation2 + $0x10] sm:$0xff]   ;;  %v50_v16 = vpack.c.bf16 %v44_v14, %v43_v11  ;;  %v757_v17 = vld [vmem:[#allocation2 + $0x58] sm:$0xff]   ;;  %v759_v19 = vld [vmem:[#allocation2 + $0x60] sm:$0xff]  }
  0x18   :  { %105 = vmatpush1.bf16.msra.mxu0 %v750_v4  ;;  %667 = vmatprep.subr.bf16.mxu1 %v753_v10  ;;  %v758_v18 = vld [vmem:[#allocation2 + $0x18] sm:$0xff]   ;;  %v45_v20 = vld [vmem:[%s940_s0 + $0x20] sm:$0xff]  ;;  %v46_v21 = vld [vmem:[%s940_s0 + $0x28] sm:$0xff] }
  0x19   :  { %v760_v22 = vld [vmem:[#allocation2 + $0x20] sm:$0xff]   ;;  %v761_v23 = vld [vmem:[#allocation2 + $0x68] sm:$0xff]   ;;  %v51_v24 = vpack.c.bf16 %v46_v21, %v45_v20  ;;  %v47_v25 = vld [vmem:[%s940_s0 + $0x30] sm:$0xff] }
  0x1a   :  { %v48_v26 = vld [vmem:[%s940_s0 + $0x38] sm:$0xff]  ;;  %v762_v28 = vld [vmem:[#allocation2 + $0x28] sm:$0xff]   ;;  %v763_v29 = vld [vmem:[#allocation2 + $0x70] sm:$0xff]  }
  0x1b   :  { %596 = vmatmul.mubr.msk.bf16.vlgmr.msra.gmra.mrb[0].mxu0 %vm89_vm0, %v49_v7  ;;  %668 = vmatpush3.bf16.msra.mxu1 %v754_v12  ;;  %v52_v27 = vpack.c.bf16 %v48_v26, %v47_v25  ;;  %v764_v30 = vld [vmem:[#allocation2 + $0x30] sm:$0xff]   ;;  %v765_v31 = vld [vmem:[#allocation2 + $0x78] sm:$0xff]   ;;  %v767_v33 = vld [vmem:[%s945_s5] sm:$0xff]  }
  0x1c   :  { %144 = vmatprep.mubr.bf16.mxu0 %v802_v0  ;;  %669 = vmatprep.subr.bf16.mxu1 %v755_v13  ;;  %v766_v32 = vld [vmem:[#allocation2 + $0x38] sm:$0xff]   ;;  %v768_v34 = vld [vmem:[%s945_s5 + $0x8] sm:$0xff]   ;;  %v769_v35 = vld [vmem:[%s945_s5 + $0x10] sm:$0xff]  }
  0x1d   :  { %717 = vmatprep.subr.bf16.mxu0 %v767_v33  ;;  %v57_v39 = vld [vmem:[%s942_s2] sm:$0x3]  ;;  %v772_v37 = vld [vmem:[%s945_s5 + $0x28] sm:$0xff]  }
  0x1e   :  { %718 = vmatpush3.bf16.msra.mxu0 %v767_v33  ;;  %v62_v41 = vrot.slane %v57_v39, %v61_v38  ;;  %v66_v42 = vrot.slane %v57_v39, %v65_v40  ;;  %v771_v36 = vld [vmem:[%s945_s5 + $0x20] sm:$0xff]   ;;  %v773_v38 = vld [vmem:[%s945_s5 + $0x30] sm:$0xff]   ;;  %v774_v39 = vld [vmem:[%s945_s5 + $0x38] sm:$0xff]  }
  0x1f   :  { %670 = vmatpush3.bf16.msra.mxu1 %v756_v15  ;;  %719 = vmatprep.subr.bf16.mxu0 %v768_v34 }
  0x20   :  { %671 = vmatprep.subr.bf16.mxu1 %v757_v17 }
  0x22   :  { %720 = vmatpush3.bf16.msra.mxu0 %v768_v34 }
  0x23   :  { %597 = vmatmul.mubr.msk.bf16.gmra.mrb[4].mxu0 %vm89_vm0, %v50_v16  ;;  %672 = vmatpush3.bf16.msra.mxu1 %v758_v18 }
  0x24   :  { %154 = vmatprep.mubr.bf16.mxu0 %v802_v0  ;;  %673 = vmatprep.subr.bf16.mxu1 %v759_v19 }
  0x25   :  { %721 = vmatprep.subr.bf16.mxu0 %v769_v35 }
  0x26   :  { %722 = vmatpush3.bf16.msra.mxu0 %v769_v35  ;;  %v770_v35 = vld [vmem:[%s945_s5 + $0x18] sm:$0xff]  }
  0x27   :  { %674 = vmatpush3.bf16.msra.mxu1 %v760_v22  ;;  %723 = vmatprep.subr.bf16.mxu0 %v770_v35 }
  0x28   :  { %675 = vmatprep.subr.bf16.mxu1 %v761_v23 }
  0x2a   :  { %724 = vmatpush3.bf16.msra.mxu0 %v770_v35 }
  0x2b   :  { %598 = vmatmul.mubr.msk.bf16.gmra.mrb[8].mxu0 %vm89_vm0, %v51_v24  ;;  %676 = vmatpush3.bf16.msra.mxu1 %v762_v28 }
  0x2c   :  { %164 = vmatprep.mubr.bf16.mxu0 %v802_v0  ;;  %677 = vmatprep.subr.bf16.mxu1 %v763_v29 }
  0x2d   :  { %725 = vmatprep.subr.bf16.mxu0 %v771_v36 }
  0x2e   :  { %726 = vmatpush3.bf16.msra.mxu0 %v771_v36 }
  0x2f   :  { %678 = vmatpush3.bf16.msra.mxu1 %v764_v30  ;;  %727 = vmatprep.subr.bf16.mxu0 %v772_v37 }
  0x30   :  { %679 = vmatprep.subr.bf16.mxu1 %v765_v31 }
  0x32   :  { %728 = vmatpush3.bf16.msra.mxu0 %v772_v37 }
  0x33   :  { %599 = vmatmul.mubr.msk.bf16.gmra.mrb[12].mxu0 %vm89_vm0, %v52_v27  ;;  %680 = vmatpush3.bf16.msra.mxu1 %v766_v32 }
  0x34   :  { %729 = vmatprep.subr.bf16.mxu0 %v773_v38 }
  0x36   :  { %730 = vmatpush3.bf16.msra.mxu0 %v773_v38 }
  0x37   :  { %731 = vmatprep.subr.bf16.mxu0 %v774_v39 }
  0x3a   :  { %732 = vmatpush3.bf16.msra.mxu0 %v774_v39 }
  0xee   :  { %v136_v43 = vpop.f32.mrb[0].mxu0 }
  0xef   :  { %v137_v44 = vadd.f32 %v136_v43, %v62_v41  ;;  %v138_v45 = vpop.f32.mrb[1].mxu0 }
  0xf0   :  { %v139_v46 = vadd.f32 %v138_v45, %v66_v42  ;;  %v140_v47 = vpop.f32.mrb[2].mxu0 }
  0xf1   :  { %v141_v48 = vadd.f32 %v140_v47, %v62_v41  ;;  %v142_v49 = vpop.f32.mrb[3].mxu0  ;;  %v175_v51 = vmax.f32 %v137_v44, 0.0 }
  0xf2   :  { %v143_v50 = vadd.f32 %v142_v49, %v66_v42  ;;  %v176_v53 = vmax.f32 %v139_v46, 0.0 }
  0xf3   :  { %v177_v52 = vmax.f32 %v141_v48, 0.0 }
  0xf4   :  { %v178_v54 = vmax.f32 %v143_v50, 0.0 }
  0xf5   :  { %v191_v55 = vpack.c.bf16 %v177_v52, %v175_v51 }
  0xf6   :  { %v146_v56 = vpop.f32.mrb[4].mxu0  ;;  %v192_v57 = vpack.c.bf16 %v178_v54, %v176_v53 }
  0xf7   :  { %v147_v58 = vadd.f32 %v146_v56, %v62_v41  ;;  %v148_v59 = vpop.f32.mrb[5].mxu0 }
  0xf8   :  { %v149_v60 = vadd.f32 %v148_v59, %v66_v42  ;;  %v150_v61 = vpop.f32.mrb[6].mxu0  ;;  %366 = vmatprep.mubr.bf16.mxu1 %v192_v57 }
  0xf9   :  { %v151_v62 = vadd.f32 %v150_v61, %v62_v41  ;;  %v152_v63 = vpop.f32.mrb[7].mxu0  ;;  %367 = vmatmul.mubr.bf16.vlgmr.msra.gmra.mrb[0].mxu1 %v191_v55  ;;  %v179_v1 = vmax.f32 %v147_v58, 0.0 }
  0xfa   :  { %v153_v0 = vadd.f32 %v152_v63, %v66_v42  ;;  %v180_v3 = vmax.f32 %v149_v60, 0.0 }
  0xfb   :  { %v181_v2 = vmax.f32 %v151_v62, 0.0 }
  0xfc   :  { %v182_v4 = vmax.f32 %v153_v0, 0.0 }
  0xfd   :  { %v193_v5 = vpack.c.bf16 %v181_v2, %v179_v1 }
  0xfe   :  { %v194_v6 = vpack.c.bf16 %v182_v4, %v180_v3  ;;  %v156_v7 = vpop.f32.mrb[8].mxu0 }
  0xff   :  { %v157_v8 = vadd.f32 %v156_v7, %v62_v41  ;;  %v158_v9 = vpop.f32.mrb[9].mxu0 }
 0x100   :  { %v159_v10 = vadd.f32 %v158_v9, %v66_v42  ;;  %v160_v11 = vpop.f32.mrb[10].mxu0  ;;  %374 = vmatprep.mubr.bf16.mxu1 %v194_v6 }
 0x101   :  { %v161_v12 = vadd.f32 %v160_v11, %v62_v41  ;;  %v162_v13 = vpop.f32.mrb[11].mxu0  ;;  %375 = vmatmul.mubr.bf16.gmra.mrb[4].mxu1 %v193_v5  ;;  %v183_v15 = vmax.f32 %v157_v8, 0.0 }
 0x102   :  { %v163_v14 = vadd.f32 %v162_v13, %v66_v42  ;;  %v184_v17 = vmax.f32 %v159_v10, 0.0 }
 0x103   :  { %v185_v16 = vmax.f32 %v161_v12, 0.0 }
 0x104   :  { %v186_v18 = vmax.f32 %v163_v14, 0.0 }
 0x105   :  { %v195_v19 = vpack.c.bf16 %v185_v16, %v183_v15 }
 0x106   :  { %v196_v20 = vpack.c.bf16 %v186_v18, %v184_v17  ;;  %v166_v21 = vpop.f32.mrb[12].mxu0 }
 0x107   :  { %v167_v22 = vadd.f32 %v166_v21, %v62_v41  ;;  %v168_v23 = vpop.f32.mrb[13].mxu0 }
 0x108   :  { %v169_v24 = vadd.f32 %v168_v23, %v66_v42  ;;  %v170_v25 = vpop.f32.mrb[14].mxu0  ;;  %382 = vmatprep.mubr.bf16.mxu1 %v196_v20 }
 0x109   :  { %v171_v26 = vadd.f32 %v170_v25, %v62_v41  ;;  %v172_v27 = vpop.f32.mrb[15].mxu0  ;;  %383 = vmatmul.mubr.bf16.gmra.mrb[8].mxu1 %v195_v19  ;;  %v187_v29 = vmax.f32 %v167_v22, 0.0  ;;  %v600_v41 = vld [vmem:[%s944_s4] ss:$0 sm:$0xff] }
 0x10a   :  { %v173_v28 = vadd.f32 %v172_v27, %v66_v42  ;;  %v188_v31 = vmax.f32 %v169_v24, 0.0  ;;  %v617_v22 = vld [vmem:[%s946_s6] ss:$0 sm:$0xff] }
 0x10b   :  { %v189_v30 = vmax.f32 %v171_v26, 0.0 }
 0x10c   :  { %v190_v32 = vmax.f32 %v173_v28, 0.0 }
 0x10d   :  { %v197_v33 = vpack.c.bf16 %v189_v30, %v187_v29 }
 0x10e   :  { %v198_v34 = vpack.c.bf16 %v190_v32, %v188_v31 }
 0x110   :  { %390 = vmatprep.mubr.bf16.mxu1 %v198_v34 }
 0x111   :  { %391 = vmatmul.mubr.bf16.gmra.mrb[12].mxu1 %v197_v33 }
 0x1cc   :  { %v681_v40 = vpop.f32.mrb[0].mxu1 }
 0x1cd   :  { %v682_v42 = vpop.f32.mrb[1].mxu1 }
 0x1ce   :  { %v683_v43 = vadd.f32 %v682_v42, %v681_v40  ;;  %v684_v44 = vpop.f32.mrb[2].mxu1 }
 0x1cf   :  { %v685_v45 = vpop.f32.mrb[3].mxu1 }
 0x1d0   :  { %v369_v46 = vadd.f32 %v683_v43, %v600_v41  ;;  %v686_v47 = vadd.f32 %v685_v45, %v684_v44 }
 0x1d2   :  { %v372_v48 = vadd.f32 %v686_v47, %v600_v41  ;;  %v399_v49 = vmax.f32 %v369_v46, 0.0 }
 0x1d4   :  { %v400_v50 = vmax.f32 %v372_v48, 0.0  ;;  %v687_v51 = vpop.f32.mrb[4].mxu1 }
 0x1d5   :  { %v688_v52 = vpop.f32.mrb[5].mxu1 }
 0x1d6   :  { %v689_v53 = vadd.f32 %v688_v52, %v687_v51  ;;  %v690_v54 = vpop.f32.mrb[6].mxu1  ;;  %v407_v55 = vpack.c.bf16 %v400_v50, %v399_v49 }
 0x1d7   :  { %v691_v56 = vpop.f32.mrb[7].mxu1 }
 0x1d8   :  { %v377_v57 = vadd.f32 %v689_v53, %v600_v41  ;;  %v692_v58 = vadd.f32 %v691_v56, %v690_v54  ;;  %733 = vmatprep.mubr.bf16.mxu0 %v407_v55 }
 0x1da   :  { %v380_v59 = vadd.f32 %v692_v58, %v600_v41  ;;  %v401_v60 = vmax.f32 %v377_v57, 0.0 }
 0x1dc   :  { %v402_v61 = vmax.f32 %v380_v59, 0.0  ;;  %v693_v62 = vpop.f32.mrb[8].mxu1 }
 0x1dd   :  { %v694_v63 = vpop.f32.mrb[9].mxu1 }
 0x1de   :  { %v408_v0 = vpack.c.bf16 %v402_v61, %v401_v60  ;;  %v695_v1 = vadd.f32 %v694_v63, %v693_v62  ;;  %v696_v2 = vpop.f32.mrb[10].mxu1 }
 0x1df   :  { %v697_v3 = vpop.f32.mrb[11].mxu1 }
 0x1e0   :  { %v385_v4 = vadd.f32 %v695_v1, %v600_v41  ;;  %v698_v5 = vadd.f32 %v697_v3, %v696_v2  ;;  %734 = vmatmul.mubr.bf16.vlgmr.msra.gmra.mrb[16].mxu0 %v408_v0 }
 0x1e2   :  { %v388_v6 = vadd.f32 %v698_v5, %v600_v41  ;;  %v403_v7 = vmax.f32 %v385_v4, 0.0 }
 0x1e4   :  { %v404_v8 = vmax.f32 %v388_v6, 0.0  ;;  %v699_v9 = vpop.f32.mrb[12].mxu1 }
 0x1e5   :  { %v700_v10 = vpop.f32.mrb[13].mxu1 }
 0x1e6   :  { %v701_v11 = vadd.f32 %v700_v10, %v699_v9  ;;  %v702_v12 = vpop.f32.mrb[14].mxu1  ;;  %v409_v13 = vpack.c.bf16 %v404_v8, %v403_v7 }
 0x1e7   :  { %v703_v14 = vpop.f32.mrb[15].mxu1 }
 0x1e8   :  { %v393_v15 = vadd.f32 %v701_v11, %v600_v41  ;;  %v704_v16 = vadd.f32 %v703_v14, %v702_v12  ;;  %737 = vmatprep.mubr.bf16.mxu0 %v409_v13 }
 0x1ea   :  { %v396_v17 = vadd.f32 %v704_v16, %v600_v41  ;;  %v405_v18 = vmax.f32 %v393_v15, 0.0 }
 0x1ec   :  { %v406_v19 = vmax.f32 %v396_v17, 0.0 }
 0x1ee   :  { %v410_v20 = vpack.c.bf16 %v406_v19, %v405_v18 }
 0x1f0   :  { %738 = vmatmul.mubr.bf16.gmra.mrb[20].mxu0 %v410_v20 }
 0x2b3   :  { %v735_v21 = vpop.f32.mrb[16].mxu0 }
 0x2b4   :  { %v516_v23 = vpop.f32.mrb[17].mxu0  ;;  %v525_v25 = vadd.f32 %v735_v21, %v617_v22 }
 0x2b5   :  { %v736_v24 = vpop.f32.mrb[18].mxu0  ;;  %v517_v28 = vadd.f32 %v617_v22, %v516_v23 }
 0x2b6   :  { %v528_v26 = vadd.f32 %v736_v24, %v617_v22  ;;  %v519_v27 = vpop.f32.mrb[19].mxu0 }
 0x2b7   :  { %v520_v29 = vadd.f32 %v617_v22, %v519_v27 }
 0x2b8   :  { %v650_v30 = vpack.c.bf16 %v528_v26, %v525_v25 }
 0x2b9   :  { %v645_v31 = vpack.c.bf16 %v520_v29, %v517_v28 }
 0x2ba   :  { %662 = vst [vmem:[%s947_s7 + $0x8] sm:$0xff] %v650_v30  }
 0x2bb   :  { %646 = vst [vmem:[%s947_s7] sm:$0xff] %v645_v31  }
 0x2c3   :  { %v739_v32 = vpop.f32.mrb[20].mxu0 }
 0x2c4   :  { %v532_v33 = vpop.f32.mrb[21].mxu0  ;;  %v541_v35 = vadd.f32 %v739_v32, %v617_v22 }
 0x2c5   :  { %v740_v34 = vpop.f32.mrb[22].mxu0  ;;  %v533_v38 = vadd.f32 %v617_v22, %v532_v33 }
 0x2c6   :  { %v544_v36 = vadd.f32 %v740_v34, %v617_v22  ;;  %v535_v37 = vpop.f32.mrb[23].mxu0 }
 0x2c7   :  { %v536_v39 = vadd.f32 %v617_v22, %v535_v37 }
 0x2c8   :  { %v660_v40 = vpack.c.bf16 %v544_v36, %v541_v35 }
 0x2c9   :  { %v655_v41 = vpack.c.bf16 %v536_v39, %v533_v38 }
 0x2ca   :  { %664 = vst [vmem:[%s947_s7 + $0x18] sm:$0xff] %v660_v40  }
 0x2cb   :  { %663 = vst [vmem:[%s947_s7 + $0x10] sm:$0xff] %v655_v41  }
 0x2cc   :  { %591 = vsyncpa [#allocation3], 1 }

</bundles_post_ra>
